<compile_context>
chip_gen: v7x
topology: tpu7x:2x2x1
jax: 0.10.0
libtpu: 0.0.40
codegen_flags: <defaults>
</compile_context>

<pallas_src>
import math

import jax
import jax.numpy as jnp
from jax.experimental import pallas as pl
from jax.experimental.pallas import tpu as pltpu

_LANE = 128
_MIB = 1024 * 1024


def _embedder_kernel(x_ref, w_ref, b_ref, o_ref):
    # x_ref: (1, dim, TN)   w_ref: (dim_embed, dim)   b_ref: (dim_embed, 1) f32
    # o_ref: (1, dim_embed, TN)
    x = x_ref[0]                                               # (dim, TN)
    w = w_ref[...]                                             # (dim_embed, dim)
    out = jnp.dot(w, x, preferred_element_type=jnp.float32)    # MXU, f32 acc
    out = out + b_ref[...]                                     # lane-broadcast bias (f32)
    o_ref[0] = out.astype(o_ref.dtype)                         # single lane-dense store


def _cdiv(a, b):
    return (a + b - 1) // b


def _round_down(v, m):
    return (v // m) * m


def _vmem_capacity_bytes():
    """Best-effort per-core VMEM capacity; conservative fallback (v7x)."""
    try:
        info = pltpu.get_tpu_info()
        cap = getattr(info, "vmem_capacity_bytes", None)
        if cap:
            return int(cap)
    except Exception:
        pass
    return 64 * _MIB


def _pick_tile_n(n_work, dim, dim_embed, x_bytes, o_bytes, w_bytes,
                 param_bufs, x_bufs, budget_bytes, batch, cap=8192):
    """Largest 128-multiple lane tile that fits the VMEM budget, then shrunk
    just enough to keep >= 4 grid steps (v7x has 2 TensorCores)."""
    max_tn = max(min(cap, _round_down(n_work, _LANE)), _LANE)

    per_lane = x_bufs * dim * x_bytes + 2 * dim_embed * o_bytes     # out double-buffered
    fixed = param_bufs * (dim_embed * dim * w_bytes + dim_embed * 4)
    avail = max(budget_bytes - fixed, per_lane * _LANE)

    tn = _round_down(avail // per_lane, _LANE)
    tn = max(min(tn, max_tn), _LANE)

    # Megacore balance: don't grow the tile past the point where one core
    # gets (nearly) all the work, but keep a floor so per-step overhead and
    # short DMA bursts don't dominate.
    min_tn = 256 if n_work >= 256 else _LANE
    min_tn = min(min_tn, max_tn)
    while tn > min_tn and batch * _cdiv(n_work, tn) < 4:
        tn = max(_round_down(tn // 2, _LANE), min_tn)
    return tn


def _spec(block_shape, index_map, bufs):
    """BlockSpec with optional explicit buffer count (None/2 -> default)."""
    if bufs is None or bufs == 2:
        return pl.BlockSpec(block_shape, index_map)
    return pl.BlockSpec(block_shape, index_map, pipeline_mode=pl.Buffered(bufs))


def embedder_forward(x, weight, bias=None, *, tile_n=None, compute_dtype=None,
                     out_dtype=None, vmem_budget_bytes=None, x_buffers=2,
                     single_buffer_params=None):
    """
    Args:
        x:      [b, dim, N]               (NCL, same as PyTorch Conv1d input)
        weight: [dim_embed, dim] or [dim_embed, dim, 1] (Conv1d weight)
        bias:   [dim_embed] or None
        tile_n: optional lane-tile override (128-multiple); default = auto.
        compute_dtype: optional narrower dtype for x/W (e.g. bf16).  Only a
                       net HBM win if x already lives in that dtype; MXU
                       accumulation stays f32 either way.
        out_dtype: output dtype (default x.dtype).  Narrowing this is the
                   bigger lever when dim_embed > dim (output stream dominates).
        vmem_budget_bytes: VMEM budget for tile sizing; default = half the
                   per-core VMEM capacity (also passed to the compiler).
        x_buffers: pipeline depth for the x stream (2 default, 3 if DMA exposed).
        single_buffer_params: single-buffer the constant weight/bias blocks
                   (default: auto, on when weight >= 1 MiB).
    Returns:
        [b, dim_embed, N] in out_dtype (default: x.dtype).
    """
    b, dim, N = x.shape
    if weight.ndim == 3:                      # Conv1d layout [out_c, in_c, 1]
        weight = weight.reshape(weight.shape[0], weight.shape[1])
    dim_embed = weight.shape[0]

    out_dtype = x.dtype if out_dtype is None else jnp.dtype(out_dtype)
    if compute_dtype is not None:
        x = x.astype(compute_dtype)
        weight = weight.astype(compute_dtype)
    # Bias kept in f32: added after the f32 MXU accumulation (matches Conv1d).
    if bias is None:
        bias2d = jnp.zeros((dim_embed, 1), jnp.float32)
    else:
        bias2d = bias.astype(jnp.float32).reshape(dim_embed, 1)

    x_bytes = jnp.dtype(x.dtype).itemsize
    w_bytes = jnp.dtype(weight.dtype).itemsize
    o_bytes = jnp.dtype(out_dtype).itemsize

    # Per-chip VMEM budget, actually communicated to the compiler.
    vmem_cap = _vmem_capacity_bytes()
    if vmem_budget_bytes is None:
        vmem_budget_bytes = min(vmem_cap // 2, 64 * _MIB)
    vmem_limit = int(min(int(vmem_budget_bytes * 1.25), vmem_cap))

    # Single-buffer the constant (never re-fetched) weight/bias when big
    # enough for double-buffering to matter (v7x VMEM is half of v5e/v6e).
    w_total_bytes = dim_embed * dim * w_bytes
    if single_buffer_params is None:
        single_buffer_params = w_total_bytes >= 1 * _MIB
    param_bufs = 1 if single_buffer_params else 2

    # N handling: no tile-multiple padding.  Only pad the tiny N < 128 case so
    # the output last dim stays lane-dense; ragged last tiles are masked.
    if N < _LANE:
        x = jnp.pad(x, ((0, 0), (0, 0), (0, _LANE - N)))
        n_work = _LANE
    else:
        n_work = N

    if tile_n is None:
        tn = _pick_tile_n(n_work, dim, dim_embed, x_bytes, o_bytes, w_bytes,
                          param_bufs, x_buffers, vmem_budget_bytes, b)
    else:
        tn = max(_round_down(min(tile_n, n_work), _LANE), _LANE)
    n_tiles = _cdiv(n_work, tn)

    flops = 2 * b * dim_embed * dim * N
    bytes_accessed = (b * dim * n_work * x_bytes
                      + dim_embed * dim * w_bytes + dim_embed * 4
                      + b * dim_embed * n_work * o_bytes)

    param_mode = 1 if single_buffer_params else None
    in_specs = [
        # x: one (dim, TN) slab per (batch, N-tile) step.
        _spec((1, dim, tn), lambda i, j: (i, 0, j), x_buffers),
        # Constant block index -> weight / bias stay VMEM-resident.
        _spec((dim_embed, dim), lambda i, j: (0, 0), param_mode),
        _spec((dim_embed, 1), lambda i, j: (0, 0), param_mode),
    ]

    out = pl.pallas_call(
        _embedder_kernel,
        out_shape=jax.ShapeDtypeStruct((b, dim_embed, n_work), out_dtype),
        grid_spec=pltpu.PrefetchScalarGridSpec(
            num_scalar_prefetch=0,
            grid=(b, n_tiles),
            in_specs=in_specs,
            out_specs=pl.BlockSpec((1, dim_embed, tn), lambda i, j: (i, 0, j)),
        ),
        compiler_params=pltpu.CompilerParams(
            dimension_semantics=("parallel", "parallel"),
            vmem_limit_bytes=vmem_limit,
        ),
        cost_estimate=pl.CostEstimate(
            flops=int(flops), transcendentals=0,
            bytes_accessed=int(bytes_accessed)),
    )(x, weight, bias2d)

    if n_work != N:
        out = out[:, :, :N]
    return out


def embedder_reference(x, weight, bias):
    # out[b, e, n] = sum_d W[e, d] * x[b, d, n] + bias[e]
    return jnp.einsum("ed,bdn->ben", weight, x) + bias[None, :, None]


if __name__ == "__main__":
    key = jax.random.PRNGKey(0)

    # --- Test 1: small shapes consistent with the module's forward (N < 128 path).
    b, dim, N, dim_embed = 2, 4, 16, 32
    kx, kw, kb, kx2, kw2, kb2 = jax.random.split(key, 6)

    x = jax.random.normal(kx, (b, dim, N), dtype=jnp.float32)
    bound = 1.0 / math.sqrt(dim)
    weight = jax.random.uniform(kw, (dim_embed, dim), jnp.float32, -bound, bound)
    bias = jax.random.uniform(kb, (dim_embed,), jnp.float32, -bound, bound)

    out = embedder_forward(x, weight, bias)
    out = jax.block_until_ready(out)
    ref = embedder_reference(x, weight, bias)
    assert out.shape == (b, dim_embed, N)
    assert jnp.allclose(out, ref, atol=1e-5, rtol=1e-5)

    # --- Test 2: ragged N (not a multiple of 128) exercises the no-pad
    #     masked-last-tile path and the auto tile/megacore sizing.
    b2, dim2, N2, dim_embed2 = 1, 8, 1000, 64
    x2 = jax.random.normal(kx2, (b2, dim2, N2), dtype=jnp.float32)
    bound2 = 1.0 / math.sqrt(dim2)
    weight2 = jax.random.uniform(kw2, (dim_embed2, dim2, 1), jnp.float32, -bound2, bound2)
    bias2 = jax.random.uniform(kb2, (dim_embed2,), jnp.float32, -bound2, bound2)

    out2 = embedder_forward(x2, weight2, bias2)
    out2 = jax.block_until_ready(out2)
    ref2 = embedder_reference(x2, weight2.reshape(dim_embed2, dim2), bias2)
    assert out2.shape == (b2, dim_embed2, N2)
    assert jnp.allclose(out2, ref2, atol=1e-5, rtol=1e-5)

    print("KERNEL_OK")
</pallas_src>

<mosaic_0001>
module attributes {stable_mosaic.version = 11 : i64} {
  func.func @_embedder_kernel(%arg0: i32, %arg1: i32, %arg2: memref<1x4x128xf32, #tpu.memory_space<vmem>>, %arg3: memref<32x4xf32, #tpu.memory_space<vmem>>, %arg4: memref<32x1xf32, #tpu.memory_space<vmem>>, %arg5: memref<1x32x128xf32, #tpu.memory_space<vmem>>) attributes {dimension_semantics = [#tpu.dimension_semantics<parallel>, #tpu.dimension_semantics<parallel>], iteration_bounds = array<i64: 2, 1>, scalar_prefetch = 0 : i64, scratch_operands = 0 : i64, tpu.core_type = #tpu.core_type<tc>, window_params = [{transform_indices = @transform_0, window_bounds = array<i64: 1, 4, 128>}, {pipeline_mode = #tpu.pipeline_mode<synchronous>, transform_indices = @transform_1, window_bounds = array<i64: 32, 4>}, {pipeline_mode = #tpu.pipeline_mode<synchronous>, transform_indices = @transform_2, window_bounds = array<i64: 32, 1>}, {transform_indices = @transform_3, window_bounds = array<i64: 1, 32, 128>}]} {
    %c0 = arith.constant 0 : index
    %c0_0 = arith.constant 0 : index
    %c0_1 = arith.constant 0 : index
    %0 = vector.load %arg2[%c0, %c0_0, %c0_1] : memref<1x4x128xf32, #tpu.memory_space<vmem>>, vector<1x4x128xf32>
    %1 = vector.shape_cast %0 : vector<1x4x128xf32> to vector<4x128xf32>
    %c0_2 = arith.constant 0 : index
    %c0_3 = arith.constant 0 : index
    %2 = vector.load %arg3[%c0_2, %c0_3] : memref<32x4xf32, #tpu.memory_space<vmem>>, vector<32x4xf32>
    %cst = arith.constant dense<0.000000e+00> : vector<32x128xf32>
    %3 = tpu.matmul %2, %1, %cst {dimension_numbers = #tpu.dot_dimension_numbers<[1], [0], [0], [1], [0, 0, 1, 1], [], []>} : vector<32x4xf32>, vector<4x128xf32>, vector<32x128xf32> -> vector<32x128xf32>
    %c0_4 = arith.constant 0 : index
    %c0_5 = arith.constant 0 : index
    %4 = vector.load %arg4[%c0_4, %c0_5] : memref<32x1xf32, #tpu.memory_space<vmem>>, vector<32x1xf32>
    %5 = vector.broadcast %4 : vector<32x1xf32> to vector<32x128xf32>
    %6 = arith.addf %3, %5 : vector<32x128xf32>
    %c0_6 = arith.constant 0 : index
    %c0_7 = arith.constant 0 : index
    %c0_8 = arith.constant 0 : index
    %7 = vector.load %arg5[%c0_6, %c0_7, %c0_8] : memref<1x32x128xf32, #tpu.memory_space<vmem>>, vector<1x32x128xf32>
    %8 = vector.shape_cast %7 : vector<1x32x128xf32> to vector<32x128xf32>
    %9 = vector.shape_cast %6 : vector<32x128xf32> to vector<1x32x128xf32>
    tpu.vector_store %arg5[%c0_6, %c0_7, %c0_8], %9 {strides = array<i32>} : memref<1x32x128xf32, #tpu.memory_space<vmem>>, vector<1x32x128xf32>,
    return
  }
  func.func @transform_0(%arg0: i32, %arg1: i32) -> (i32, i32, i32) {
    %c0_i32 = arith.constant 0 : i32
    %c0_i32_0 = arith.constant 0 : i32
    return %arg0, %c0_i32, %arg1 : i32, i32, i32
  }
  func.func @transform_1(%arg0: i32, %arg1: i32) -> (i32, i32) {
    %c0_i32 = arith.constant 0 : i32
    %c0_i32_0 = arith.constant 0 : i32
    %c0_i32_1 = arith.constant 0 : i32
    return %c0_i32, %c0_i32_0 : i32, i32
  }
  func.func @transform_2(%arg0: i32, %arg1: i32) -> (i32, i32) {
    %c0_i32 = arith.constant 0 : i32
    %c0_i32_0 = arith.constant 0 : i32
    %c0_i32_1 = arith.constant 0 : i32
    return %c0_i32, %c0_i32_0 : i32, i32
  }
  func.func @transform_3(%arg0: i32, %arg1: i32) -> (i32, i32, i32) {
    %c0_i32 = arith.constant 0 : i32
    %c0_i32_0 = arith.constant 0 : i32
    return %arg0, %c0_i32, %arg1 : i32, i32, i32
  }
}

</mosaic_0001>

<bundles_post_ra>
// kernel: tpu_custom_call.1
= control target key start
LH: loop header
LB: loop body
LE: loop exit
PB: predicated region body
PF: predicated region fallthrough
CT: control target
= control target key end

     0   :  { %8 = vsyncpa [#allocation3], 0  ;;  %s756_s0 = inlined_call_operand.vmem [shape: f32[2,4,128], index: 0, kind: input, shape index: {}]   ;;  %s757_s1 = inlined_call_operand.vmem [shape: f32[32,4], index: 1, kind: input, shape index: {}]   ;;  %s758_s2 = inlined_call_operand.vmem [shape: f32[32,1], index: 2, kind: input, shape index: {}]   ;;  %s759_s3 = inlined_call_operand.hbm [shape: f32[2,32,128], index: 3, kind: output, shape index: {}]  }
   0x1   :  { %10 = vsyncpa [#allocation3 + $0x1], 0  ;;  %s613_s12 = smov 0   ;;  %s615_s13 = smov 0  }
   0x2   :  { %s617_s14 = smov 0   ;;  %s619_s15 = smov 0  }
   0x3   :  { %s621_s16 = smov 0   ;;  %s623_s17 = smov 0  }
   0x4 LB: > { %s416_s18 = sadd.s32 4294967295, %s587_s17   ;;  %s417_s19 = sadd.s32 4294967294, %s587_s17   ;;  %s587_s17 = sphi %s623_s17, %s16_s17   ;;  %s583_s16 = sphi %s621_s16, %s766_s16   ;;  %s579_s15 = sphi %s619_s15, %s765_s15   ;;  %s575_s14 = sphi %s617_s14, %s764_s14   ;;  %s571_s13 = sphi %s615_s13, %s763_s13   ;;  %s567_s12 = sphi %s613_s12, %s762_s12  }
   0x5   : > { %s28_s20 = sadd.s32 1, %s583_s16  ;;  %s107_s21 = sadd.s32 1, %s575_s14 }
   0x6   : > { %p30_p0 = scmp.ge.s32.totalorder %s28_s20, 2  ;;  %p117_p1 = scmp.ne.s32.totalorder %s575_s14, %s571_s13 }
   0x7   : > { %p118_p2 = scmp.eq.s32.totalorder %s416_s18, 1  ;;  %p123_p3 = scmp.ne.s32.totalorder %s571_s13, %s567_s12 }
   0x8   : > { %s768_s20 = smov (%p30_p0, %s28_s20), 0  ;;  %p124_p5 = scmp.eq.s32.totalorder %s417_s19, 1 }
   0x9   : > { %p653_p4 = por %p118_p2, %p117_p1  ;;  %s102_s23 = ssub.s32 %s583_s16, %s768_s20 }
   0xa   : > { %p420_p6 = scmp.ge.s32.totalorder %s587_s17, 1  ;;  %p105_p7 = scmp.eq.s32.totalorder %s102_s23, 0 }
   0xb   : > { %p660_p8 = por %p124_p5, %p123_p3  ;;  %p158_p9 = scmp.lt.s32.totalorder %s587_s17, 3 }
   0xc   : > { %s666_s25 = scalar_select %p105_p7, %s575_s14, %s107_s21  }
   0xd   : > { %p159_p10 = pnand %p420_p6, %p158_p9 }
   0xe   : > { %p184_p11 = scmp.lt.s32.totalorder (!%p159_p10), %s579_s15, 1  ;;  %v192_v0 = vld [vmem:[%s757_s1] sm:$0xff] (!%p159_p10)  ;;  %vm220_vm0 = vcmask (!%p159_p10), 31744   ;;  %v194_v1 = vld [vmem:[%s757_s1 + $0x10] sm:$0xff] (!%p159_p10)  ;;  %v589_v4 = vmov (!%p159_p10), 0   ;;  %vm233_vm1 = vcmask (!%p159_p10), 1043456  }
   0xf   : > { %162 = sbr.rel (%p159_p10) target bundleno = 259 (0x103), region = 32  ;;  %441 = vmatprep.mubr.msk.f32.mxu0 (!%p159_p10), %vm220_vm0, %v192_v0  ;;  %444 = vmatprep.mubr.msk.f32.mxu1 (!%p159_p10), %vm220_vm0, %v194_v1  ;;  %v198_v2 = vld [vmem:[%s758_s2 + $0x10] sm:$0xff] (!%p159_p10)  ;;  %v196_v3 = vld [vmem:[%s758_s2] sm:$0xff] (!%p159_p10)  ;;  %v193_v6 = vld [vmem:[%s757_s1 + $0x8] sm:$0xff] (!%p159_p10)  ;;  %s181_s30 = sand.u32 (!%p159_p10), 1, %s571_s13  }
  0x10   : > { %508 = vset.pattern.permute.xlu1 (!%p159_p10), %v589_v4  ;;  %507 = vset.pattern.permute.xlu0 (!%p159_p10), %v589_v4  ;;  %v195_v7 = vld [vmem:[%s757_s1 + $0x18] sm:$0xff] (!%p159_p10)  ;;  %v197_v9 = vld [vmem:[%s758_s2 + $0x8] sm:$0xff] (!%p159_p10)  ;;  %s421_s4 = sshll.u32 (!%p159_p10), %s181_s30, 5  ;;  %s590_s18 = smov (!%p159_p10), [#allocation2]  }
  0x11   : > { %212 = vperm.xlu1 (!%p159_p10), %508, %v198_v2   ;;  %202 = vperm.xlu0 (!%p159_p10), %507, %v196_v3   ;;  %v199_v8 = vld [vmem:[%s758_s2 + $0x18] sm:$0xff] (!%p159_p10)  ;;  %s183_s5 = scalar_lea.vmem (!%p159_p10), [#allocation2], %s421_s4  ;;  %s513_s19 = sshll.u32 (!%p159_p10), %s590_s18, 4  ;;  %s514_s19 = int_to_ptr.vmem [resolvable:$false] %s513_s19 }
  0x12   : > { %s341_s6 = sshll.u32 (!%p159_p10), %s183_s5, 4  ;;  %s515_s21 = scalar_lea.vmem (!%p159_p10), %s514_s19, 1024  ;;  %s703_s6 = int_to_ptr.vmem [resolvable:$true] %s341_s6 }
  0x13   : > { %p516_p1 = scmp.lt.s32.totalorder (!%p159_p10), %s703_s6, %s514_s19 }
  0x15   : > { %217 = vperm.xlu1 (!%p159_p10), %508, %v199_v8   ;;  %207 = vperm.xlu0 (!%p159_p10), %507, %v197_v9  }
  0x16   : > { %s185_s7 = scalar_select %p184_p11, %s579_s15, 1 }
  0x18   : > { %s422_s8 = sshll.u32 %s185_s7, 2  ;;  %s433_s7 = sshll.u32 %s579_s15, 9 }
  0x19   : > { %s190_s11 = scalar_lea.vmem %s756_s0, %s422_s8  ;;  %s708_s10 = scalar_lea.hbm %s759_s3, %s433_s7 }
  0x1a   : > { %v191_v5 = vld [vmem:[%s190_s11] sm:$0xf]  ;;  %s710_s15 = scalar_lea.sflag [#allocation3], %s181_s30  ;;  %s509_s11 = scalar_lea.vmem %s703_s6, 512 }
  0x1b   : > { %439 = vmatprep.subr.msk.mxu0 %vm233_vm1, %v191_v5  ;;  %447 = vmatprep.subr.msk.mxu1 %vm233_vm1, %v191_v5  ;;  %p510_p12 = scmp.ne.s32.totalorder %s703_s6, %s509_s11  ;;  %p517_p2 = scmp.lt.s32.totalorder %s515_s21, %s509_s11 }
  0x1c   : > { %440 = vmatpush3.msk.msra.mxu0 %vm233_vm1, %v191_v5  ;;  %448 = vmatpush3.msk.msra.mxu1 %vm233_vm1, %v191_v5 }
  0x1d   : > { %442 = vmatmul.mubr.msk.f32.vlgmr.msra.gmra.mrb[0].mxu0 %vm220_vm0, %v193_v6  ;;  %445 = vmatmul.mubr.msk.f32.vlgmr.msra.gmra.mrb[0].mxu1 %vm220_vm0, %v195_v7  ;;  %p511_p13 = pnand %p510_p12, %p653_p4  ;;  %p518_p3 = por %p517_p2, %p516_p1 }
  0x1f   : > { %p512_p0 = pneg %p511_p13 }
  0x21   : > { %p519_p5 = pnand %p518_p3, %p512_p0 }
  0x90   : > { %v213_v10 = vpop.permute.xlu1 %212  ;;  %v203_v11 = vpop.permute.xlu0 %202 }
  0x94   : > { %v218_v12 = vpop.permute.xlu1 %217  ;;  %v208_v13 = vpop.permute.xlu0 %207 }
  0xf0   : > { %v443_v14 = vpop.f32.mrb[0].mxu0  ;;  %v446_v15 = vpop.f32.mrb[0].mxu1 }
  0xf1   : > { %v309_v16 = vadd.f32 %v443_v14, %v208_v13  ;;  %v319_v17 = vadd.f32 %v446_v15, %v218_v12  ;;  %v303_v18 = vpop.f32.mrb[1].mxu0  ;;  %v313_v19 = vpop.f32.mrb[1].mxu1 }
  0xf2   : > { %v304_v20 = vadd.f32 %v303_v18, %v203_v11  ;;  %v314_v21 = vadd.f32 %v313_v19, %v213_v10 }
  0xf3   : > { %323 = vst [vmem:[%s183_s5 + $0x8] sm:$0xff] %v309_v16  ;;  %325 = vst [vmem:[%s183_s5 + $0x18] sm:$0xff] %v319_v17 }
  0xf4   : > { %322 = vst [vmem:[%s183_s5] sm:$0xff] %v304_v20  ;;  %324 = vst [vmem:[%s183_s5 + $0x10] sm:$0xff] %v314_v21 }
  0xf5   : > { %522 = shalt.err (!%p519_p5)
}
  0xf6   : > { %s523_s23 = scalar_lea.hbm %s708_s10, 512  ;;  %s527_s28 = scalar_lea.hbm %s759_s3, 1024 }
  0xf7   : > { %p524_p6 = scmp.ne.s32.totalorder %s708_s10, %s523_s23  ;;  %p528_p10 = scmp.lt.u32.totalorder %s708_s10, %s759_s3 }
  0xf8   : > { %p529_p11 = scmp.lt.u32.totalorder %s527_s28, %s523_s23  ;;  %p531_p13 = scmp.lt.u32.totalorder %s523_s23, %s708_s10 }
  0xf9   : > { %p525_p7 = pnand %p524_p6, %p653_p4 }
  0xfa   : > { %p530_p12 = por %p529_p11, %p528_p10 }
  0xfb   : > { %p526_p9 = pneg %p525_p7 }
  0xfc   : > { %p532_p0 = por %p531_p13, %p530_p12 }
  0xfe   : > { %p533_p1 = pnand %p532_p0, %p526_p9 }
 0x100   : > { %536 = shalt.err (!%p533_p1)
}
 0x101   : > { %s591_s4 = smov 128   ;;  %s592_s5 = smov 8  }
 0x102   : > { %449 = dma.vmem_to_hbm [thread:$0]  (%p653_p4), %s703_s6, 512, %s708_s10, %s710_s15, %s591_s4, %s591_s4, %s592_s5  }
 0x103 PF: > { %p455_p2 = scmp.ge.s32.totalorder %s587_s17, 2  ;;  %s356_s7 = sand.u32 1, %s567_s12  }
 0x104   : > { %s357_s8 = scalar_lea.sflag [#allocation3], %s356_s7 }
 0x105   : > { %p452_p3 = pnand %p455_p2, %p660_p8 }
 0x107   : > { %562 = dma.done.wait (!%p452_p3), %s357_s8, 512  }
 0x108   : > { %564 = vsyncadd (!%p452_p3), %s357_s8, 4294966784  ;;  %s16_s17 = sadd.s32 1, %s587_s17   ;;  %s762_s12 = smov %s571_s13 }
 0x109   : > { %p13_p5 = scmp.ge.s32.totalorder %s16_s17, 4   ;;  %s763_s13 = smov %s575_s14 }
 0x10a   : > { %s764_s14 = smov %s666_s25  ;;  %s765_s15 = smov %s583_s16 }
 0x10b   : > { %s766_s16 = smov %s768_s20  ;;  %15 = sbr.rel (!%p13_p5) target bundleno = 4 (0x4), region = 67 }
 0x112   :  { %362 = vsyncpa [#allocation3], 1 }
 0x113   :  { %364 = vsyncpa [#allocation3 + $0x1], 1 }

</bundles_post_ra>
